<compile_context>
chip_gen: v7x
topology: tpu7x:2x2x1
jax: 0.10.0
libtpu: 0.0.40
codegen_flags: <defaults>
</compile_context>

<pallas_src>
import math

import jax
import jax.numpy as jnp
from jax import lax
from jax.experimental import pallas as pl
from jax.experimental.pallas import tpu as pltpu

_HALF_LOG_2PI = 0.5 * math.log(2.0 * math.pi)
_LANE = 128


# ---------------------------------------------------------------------------
# Kernels
# ---------------------------------------------------------------------------
def _split_kernel_aligned(keep_ref, split_ref, z_out_ref, ssq_ref):
    """Grid = (batch tiles, column tiles of the half-row).

    keep_ref / split_ref: (tb, n_blk) lane-dense blocks of the two channel
    halves of the same (B, 2n) input. Kept half: straight copy through VMEM.
    Discarded half: per-row sum of squares accumulated into the resident
    (tb, 1) f32 output block (written back once per batch tile).
    """
    @pl.when(pl.program_id(1) == 0)
    def _init():
        ssq_ref[...] = jnp.zeros_like(ssq_ref)

    z_out_ref[...] = keep_ref[...]
    zs = split_ref[...].astype(jnp.float32)
    ssq_ref[...] += jnp.sum(zs * zs, axis=1, keepdims=True)


def _make_split_kernel_unaligned(n):
    """Full-row variant for n % 128 != 0: one (tb, 2n) block per grid step."""

    def kernel(z_ref, z_out_ref, ssq_ref):
        z_out_ref[...] = z_ref[:, :n]                       # kept half copy
        row = z_ref[...].astype(jnp.float32)
        col = lax.broadcasted_iota(jnp.int32, row.shape, 1)
        zs = jnp.where(col >= n, row, 0.0)                  # discarded half only
        ssq_ref[...] = jnp.sum(zs * zs, axis=1, keepdims=True)

    return kernel


# ---------------------------------------------------------------------------
# Tiling heuristics
# ---------------------------------------------------------------------------
def _chip_defaults():
    """(target block bytes, minimum batch-grid steps), tuned per generation."""
    target, min_grid = 2 << 20, 1
    try:
        kind = jax.devices()[0].device_kind.lower()
        is_v5e = ("v5 lite" in kind) or ("v5e" in kind) or ("v5lite" in kind)
        if not is_v5e:
            target = 4 << 20      # v6e/v7x: faster HBM -> amortize per-step cost
        if "v7" in kind:
            min_grid = 4          # 2 TensorCores: keep both busy and pipelined
    except Exception:
        pass
    return target, min_grid


def _sublane_multiple(dtype):
    """Minimum sublane tile for a dtype: 8 (32-bit), 16 (16-bit), 32 (8-bit)."""
    bits = jnp.dtype(dtype).itemsize * 8
    return max(8, 256 // bits)


def _batch_tile_candidates(batch, sub):
    cands = {d for d in range(sub, batch + 1, sub) if batch % d == 0}
    cands.add(batch)              # full batch is always a legal block dim
    return sorted(cands)


def _pick_batch_tile(batch, sub, row_bytes, target_bytes, min_grid):
    cands = _batch_tile_candidates(batch, sub)
    fit = [c for c in cands if c * row_bytes <= target_bytes]
    if not fit:                   # even the smallest tile exceeds the target:
        fit = [cands[0]]          # take it and budget scoped VMEM explicitly
    good = [c for c in fit if batch // c >= min_grid]
    return good[-1] if good else fit[0]


def _pick_col_tile(n, tb, itemsize, target_bytes):
    """Largest 128-multiple divisor of n with tb * n_blk * itemsize <= target."""
    max_cols = max(_LANE, target_bytes // max(tb * itemsize, 1))
    for m in range(n // _LANE, 0, -1):
        cand = m * _LANE
        if cand <= max_cols and n % cand == 0:
            return cand
    return _LANE


# ---------------------------------------------------------------------------
# Public wrapper
# ---------------------------------------------------------------------------
def split_flow_forward(z, ldj):
    """Pallas implementation of SplitFlow.forward(z, ldj, reverse=False)."""
    B, C, H, W = z.shape
    assert C % 2 == 0, "channel dim must be even to chunk(2, dim=1)"
    half = C // 2
    n = half * H * W
    isz = jnp.dtype(z.dtype).itemsize
    sub = _sublane_multiple(z.dtype)
    target_bytes, min_grid = _chip_defaults()

    z2 = z.reshape(B, 2 * n)      # contiguous reshape: bitcast, no HBM pass

    if n % _LANE == 0:
        # Lane-aligned rows: halves separated at the BlockSpec level, column
        # grid bounds the block size for large C*H*W.
        tb = _pick_batch_tile(B, sub, row_bytes=_LANE * isz,
                              target_bytes=target_bytes, min_grid=min_grid)
        n_blk = _pick_col_tile(n, tb, isz, target_bytes)
        grid_n = n // n_blk
        grid = (B // tb, grid_n)

        in_specs = [
            pl.BlockSpec((tb, n_blk), lambda b, j: (b, j)),            # kept half
            pl.BlockSpec((tb, n_blk), lambda b, j: (b, j + grid_n)),   # split half
        ]
        out_specs = (
            pl.BlockSpec((tb, n_blk), lambda b, j: (b, j)),
            pl.BlockSpec((tb, 1), lambda b, j: (b, 0)),
        )
        kernel = _split_kernel_aligned
        dim_sem = ("parallel", "arbitrary")
        operands = (z2, z2)
        block_bytes = 3 * tb * n_blk * isz + tb * 4
    else:
        # Non-aligned rows: full-row blocks + in-kernel lane mask (no wrapper
        # pad / un-pad slice, hence no extra HBM passes).
        tb = _pick_batch_tile(B, sub, row_bytes=2 * n * isz,
                              target_bytes=target_bytes, min_grid=min_grid)
        grid = (B // tb,)

        in_specs = [pl.BlockSpec((tb, 2 * n), lambda b: (b, 0))]
        out_specs = (
            pl.BlockSpec((tb, n), lambda b: (b, 0)),
            pl.BlockSpec((tb, 1), lambda b: (b, 0)),
        )
        kernel = _make_split_kernel_unaligned(n)
        dim_sem = ("parallel",)
        operands = (z2,)
        block_bytes = 3 * tb * n * isz + tb * 4

    # Explicit scoped-VMEM budget: double-buffered blocks + margin, never below
    # 32 MiB (required override on v5e whose scoped default is 16 MiB).
    vmem_limit = int(max(32 << 20, 2 * block_bytes + (2 << 20)))

    z_keep, ssq = pl.pallas_call(
        kernel,
        grid=grid,
        in_specs=in_specs,
        out_specs=out_specs,
        out_shape=(
            jax.ShapeDtypeStruct((B, n), z.dtype),
            jax.ShapeDtypeStruct((B, 1), jnp.float32),
        ),
        compiler_params=pltpu.CompilerParams(
            dimension_semantics=dim_sem,
            vmem_limit_bytes=vmem_limit,
        ),
    )(*operands)

    z_out = z_keep.reshape(B, half, H, W)
    # sum(log N(0,1).pdf(x)) = -0.5 * sum(x^2) - N * 0.5*log(2*pi)
    ldj_out = ldj.astype(jnp.float32) - 0.5 * ssq[:, 0] - n * _HALF_LOG_2PI
    return z_out, ldj_out.astype(ldj.dtype)


# ---------------------------------------------------------------------------
# Self-test
# ---------------------------------------------------------------------------
def _reference(z, ldj):
    half = z.shape[1] // 2
    z_keep, z_split = z[:, :half], z[:, half:]
    logp = -0.5 * z_split * z_split - _HALF_LOG_2PI
    return z_keep, ldj + jnp.sum(logp, axis=(1, 2, 3))


if __name__ == "__main__":
    key = jax.random.PRNGKey(0)
    kz, kl, kz2, kl2 = jax.random.split(key, 4)

    # Lane-aligned case (n = 2*16*16 = 512): exercises the tiled two-spec path.
    B, C, H, W = 2, 4, 16, 16
    z = jax.random.normal(kz, (B, C, H, W), dtype=jnp.float32)
    ldj = jax.random.normal(kl, (B,), dtype=jnp.float32)
    z_out, ldj_out = split_flow_forward(z, ldj)
    jax.block_until_ready((z_out, ldj_out))
    z_ref, ldj_ref = _reference(z, ldj)
    assert z_out.shape == (B, C // 2, H, W)
    assert jnp.allclose(z_out, z_ref)
    assert jnp.allclose(ldj_out, ldj_ref, atol=1e-4, rtol=1e-5)

    # Non-128-aligned case (n = 1*6*10 = 60): exercises the masked full-row path.
    B2, C2, H2, W2 = 2, 2, 6, 10
    z_b = jax.random.normal(kz2, (B2, C2, H2, W2), dtype=jnp.float32)
    ldj_b = jax.random.normal(kl2, (B2,), dtype=jnp.float32)
    z_out_b, ldj_out_b = split_flow_forward(z_b, ldj_b)
    jax.block_until_ready((z_out_b, ldj_out_b))
    z_ref_b, ldj_ref_b = _reference(z_b, ldj_b)
    assert z_out_b.shape == (B2, C2 // 2, H2, W2)
    assert jnp.allclose(z_out_b, z_ref_b)
    assert jnp.allclose(ldj_out_b, ldj_ref_b, atol=1e-4, rtol=1e-5)

    print("KERNEL_OK")
</pallas_src>

<mosaic_0001>
module attributes {stable_mosaic.version = 11 : i64} {
  func.func @_split_kernel_aligned(%arg0: i32, %arg1: i32, %arg2: memref<2x512xf32, #tpu.memory_space<vmem>>, %arg3: memref<2x512xf32, #tpu.memory_space<vmem>>, %arg4: memref<2x512xf32, #tpu.memory_space<vmem>>, %arg5: memref<2x1xf32, #tpu.memory_space<vmem>>) attributes {dimension_semantics = [#tpu.dimension_semantics<parallel>, #tpu.dimension_semantics<arbitrary>], iteration_bounds = array<i64: 1, 1>, scalar_prefetch = 0 : i64, scratch_operands = 0 : i64, tpu.core_type = #tpu.core_type<tc>, window_params = [{transform_indices = @transform_0, window_bounds = array<i64: 2, 512>}, {transform_indices = @transform_1, window_bounds = array<i64: 2, 512>}, {transform_indices = @transform_2, window_bounds = array<i64: 2, 512>}, {transform_indices = @transform_3, window_bounds = array<i64: 2, 1>}]} {
    %c0_i32 = arith.constant 0 : i32
    %0 = arith.cmpi eq, %arg1, %c0_i32 : i32
    %1 = arith.extui %0 : i1 to i32
    %c0_i32_0 = arith.constant 0 : i32
    %2 = arith.cmpi ne, %1, %c0_i32_0 : i32
    scf.if %2 {
      %cst_10 = arith.constant 0.000000e+00 : f32
      %12 = vector.broadcast %cst_10 : f32 to vector<2x1xf32>
      %c0_11 = arith.constant 0 : index
      %c0_12 = arith.constant 0 : index
      %13 = vector.load %arg5[%c0_11, %c0_12] : memref<2x1xf32, #tpu.memory_space<vmem>>, vector<2x1xf32>
      tpu.vector_store %arg5[%c0_11, %c0_12], %12 {strides = array<i32>} : memref<2x1xf32, #tpu.memory_space<vmem>>, vector<2x1xf32>,
    } else {
    }
    %c0 = arith.constant 0 : index
    %c0_1 = arith.constant 0 : index
    %3 = vector.load %arg2[%c0, %c0_1] : memref<2x512xf32, #tpu.memory_space<vmem>>, vector<2x512xf32>
    %c0_2 = arith.constant 0 : index
    %c0_3 = arith.constant 0 : index
    %4 = vector.load %arg4[%c0_2, %c0_3] : memref<2x512xf32, #tpu.memory_space<vmem>>, vector<2x512xf32>
    tpu.vector_store %arg4[%c0_2, %c0_3], %3 {strides = array<i32>} : memref<2x512xf32, #tpu.memory_space<vmem>>, vector<2x512xf32>,
    %c0_4 = arith.constant 0 : index
    %c0_5 = arith.constant 0 : index
    %5 = vector.load %arg3[%c0_4, %c0_5] : memref<2x512xf32, #tpu.memory_space<vmem>>, vector<2x512xf32>
    %c0_6 = arith.constant 0 : index
    %c0_7 = arith.constant 0 : index
    %6 = vector.load %arg5[%c0_6, %c0_7] : memref<2x1xf32, #tpu.memory_space<vmem>>, vector<2x1xf32>
    %7 = arith.mulf %5, %5 : vector<2x512xf32>
    %cst = arith.constant dense<0.000000e+00> : vector<2xf32>
    %8 = vector.multi_reduction <add>, %7, %cst [1] : vector<2x512xf32> to vector<2xf32>
    %9 = vector.shape_cast %8 : vector<2xf32> to vector<2x1xf32>
    %10 = arith.addf %6, %9 : vector<2x1xf32>
    %c0_8 = arith.constant 0 : index
    %c0_9 = arith.constant 0 : index
    %11 = vector.load %arg5[%c0_8, %c0_9] : memref<2x1xf32, #tpu.memory_space<vmem>>, vector<2x1xf32>
    tpu.vector_store %arg5[%c0_8, %c0_9], %10 {strides = array<i32>} : memref<2x1xf32, #tpu.memory_space<vmem>>, vector<2x1xf32>,
    return
  }
  func.func @transform_0(%arg0: i32, %arg1: i32) -> (i32, i32) {
    %c0_i32 = arith.constant 0 : i32
    return %arg0, %arg1 : i32, i32
  }
  func.func @transform_1(%arg0: i32, %arg1: i32) -> (i32, i32) {
    %c1_i32 = arith.constant 1 : i32
    %0 = arith.addi %arg1, %c1_i32 : i32
    %c0_i32 = arith.constant 0 : i32
    return %arg0, %0 : i32, i32
  }
  func.func @transform_2(%arg0: i32, %arg1: i32) -> (i32, i32) {
    %c0_i32 = arith.constant 0 : i32
    return %arg0, %arg1 : i32, i32
  }
  func.func @transform_3(%arg0: i32, %arg1: i32) -> (i32, i32) {
    %c0_i32 = arith.constant 0 : i32
    %c0_i32_0 = arith.constant 0 : i32
    return %arg0, %c0_i32 : i32, i32
  }
}

</mosaic_0001>

<bundles_post_ra>
// kernel: tpu_custom_call.1
= control target key start
LH: loop header
LB: loop body
LE: loop exit
PB: predicated region body
PF: predicated region fallthrough
CT: control target
= control target key end

     0   :  { %9 = vsyncpa [#allocation3], 0  ;;  %s269_s0 = inlined_call_operand.hbm [shape: f32[2,1024], index: 0, kind: input, shape index: {}]   ;;  %s270_s1 = inlined_call_operand.hbm [shape: f32[2,1024], index: 1, kind: input, shape index: {}]   ;;  %s271_s2 = inlined_call_operand.hbm [shape: f32[2,512], index: 2, kind: output, shape index: {0}]   ;;  %s272_s3 = inlined_call_operand.vmem [shape: f32[2,1], index: 3, kind: output, shape index: {1}]  }
   0x1   :  { %10 = vsyncpa [#allocation6], 0 }
   0x2   :  { %11 = vsyncpa [#allocation4], 0  ;;  %s219_s14 = scalar_lea.hbm %s270_s1, 128  ;;  %s191_s15 = smov [#allocation2]  }
   0x3   :  { %s18_s16 = sshll.u32 %s191_s15, 4  ;;  %s192_s17 = smov [#allocation5]   ;;  %s19_s16 = int_to_ptr.vmem [resolvable:$true] %s18_s16 }
   0x4   :  { %s32_s18 = sshll.u32 %s192_s17, 4  ;;  %s116_s21 = scalar_lea.hbm %s269_s0, 128  ;;  %s33_s18 = int_to_ptr.vmem [resolvable:$true] %s32_s18 }
   0x5   :  { %p117_p0 = scmp.ne.s32.totalorder %s269_s0, %s116_s21  ;;  %s118_s26 = scalar_lea.hbm %s269_s0, 256 }
   0x6   :  { %p119_p1 = scmp.lt.u32.totalorder %s118_s26, %s116_s21  ;;  %p120_p2 = scmp.lt.u32.totalorder %s116_s21, %s269_s0 }
   0x8   :  { %p121_p3 = por %p120_p2, %p119_p1 }
   0xa   :  { %p122_p4 = pnand %p121_p3, %p117_p0 }
   0xc   :  { %125 = shalt.err (!%p122_p4)
}
   0xd   :  { %s126_s29 = scalar_lea.vmem %s19_s16, 128  ;;  %p131_p6 = scmp.lt.s32.totalorder %s19_s16, %s19_s16 }
   0xe   :  { %p127_p5 = scmp.ne.s32.totalorder %s19_s16, %s126_s29  ;;  %p132_p7 = scmp.lt.s32.totalorder %s126_s29, %s126_s29 }
  0x10   :  { %p133_p8 = por %p132_p7, %p131_p6 }
  0x12   :  { %p134_p9 = pnand %p133_p8, %p127_p5 }
  0x14   :  { %137 = shalt.err (!%p134_p9)
}
  0x15   :  { %21 = dma.hbm_to_vmem [thread:$0]  %s269_s0, 128, %s19_s16, [#allocation3]  }
  0x16   :  { %s162_s7 = scalar_lea.hbm %s270_s1, 256  ;;  %p141_p11 = scmp.lt.u32.totalorder %s219_s14, %s270_s1 }
  0x17   :  { %p139_p10 = scmp.ne.s32.totalorder %s219_s14, %s162_s7  ;;  %p142_p12 = scmp.lt.u32.totalorder %s162_s7, %s162_s7 }
  0x18   :  { %p144_p0 = scmp.lt.u32.totalorder %s162_s7, %s219_s14 }
  0x19   :  { %p143_p13 = por %p142_p12, %p141_p11 }
  0x1b   :  { %p145_p1 = por %p144_p0, %p143_p13 }
  0x1d   :  { %p146_p2 = pnand %p145_p1, %p139_p10 }
  0x1f   :  { %149 = shalt.err (!%p146_p2)
}
  0x20   :  { %s150_s10 = scalar_lea.vmem %s33_s18, 128  ;;  %p155_p4 = scmp.lt.s32.totalorder %s33_s18, %s33_s18 }
  0x21   :  { %p151_p3 = scmp.ne.s32.totalorder %s33_s18, %s150_s10  ;;  %p156_p5 = scmp.lt.s32.totalorder %s150_s10, %s150_s10 }
  0x23   :  { %p157_p6 = por %p156_p5, %p155_p4 }
  0x25   :  { %p158_p7 = pnand %p157_p6, %p151_p3 }
  0x27   :  { %161 = shalt.err (!%p158_p7)
}
  0x28   :  { %35 = dma.hbm_to_vmem [thread:$0]  %s219_s14, 128, %s33_s18, [#allocation6]  }
  0x29   :  { %185 = dma.done.wait [#allocation3], 128  }
  0x2a   :  { %186 = vsyncadd [#allocation3], 4294967168 }
  0x2b   :  { %187 = dma.done.wait [#allocation6], 128  }
  0x2c   :  { %188 = vsyncadd [#allocation6], 4294967168  ;;  %vm48_vm0 = vcmask 1024   ;;  %v60_v0 = vlaneseq  ;;  %v193_v1 = vmov 0.0   ;;  %v194_v2 = vmov 1983009808  }
  0x2d   :  { %49 = vst.msk [vmem:[%s272_s3] sm:$0x3] %vm48_vm0, %v193_v1  ;;  %v58_v3 = vunpack.c.l.s4 %v194_v2  ;;  %v52_v7 = vld [vmem:[#allocation5] sm:$0xff]  ;;  %vm77_vm1 = vcmask 1041408   ;;  %v50_v21 = vld [vmem:[#allocation2] sm:$0xff]  ;;  %s195_s11 = smov [#allocation7]  }
  0x2e   :  { %v61_v4 = vshrl.u32 %v60_v0, 7  ;;  %v54_v8 = vmul.f32 %v52_v7, %v52_v7  ;;  %s96_s12 = sshll.u32 %s195_s11, 4  ;;  %51 = vst [vmem:[#allocation7] sm:$0xff] %v50_v21  ;;  %s97_s12 = int_to_ptr.vmem [resolvable:$true] %s96_s12 }
  0x2f   :  { %v59_v5 = vunpack.c.0.s8 %v58_v3  ;;  %s163_s13 = scalar_lea.vmem %s97_s12, 128  ;;  %p168_p9 = scmp.lt.s32.totalorder %s97_s12, %s97_s12 }
  0x30   :  { %v56_v9 = vcombine.high %v54_v8, %v54_v8  ;;  %p164_p8 = scmp.ne.s32.totalorder %s97_s12, %s163_s13  ;;  %p169_p10 = scmp.lt.s32.totalorder %s163_s13, %s163_s13 }
  0x31   :  { %v62_v6 = vsub.s32 %v59_v5, %v61_v4 }
  0x32   :  { %p170_p11 = por %p169_p10, %p168_p9 }
  0x33   :  { %v63_v10 = vrot.slane %v54_v8, %v62_v6  ;;  %v70_v11 = vrot.slane %v56_v9, %v62_v6 }
  0x34   :  { %p171_p12 = pnand %p170_p11, %p164_p8 }
  0x35   :  { %v71_v12 = vcombine.high %v63_v10, %v63_v10  ;;  %v78_v13 = vsel %vm77_vm1, %v63_v10, 0.0  ;;  %v72_v14 = vcombine.high %v70_v11, %v70_v11  ;;  %v81_v16 = vsel %vm77_vm1, %v70_v11, 0.0 }
  0x37   :  { %v79_v15 = vsel %vm77_vm1, %v71_v12, 0.0  ;;  %v83_v18 = vsel %vm77_vm1, %v72_v14, 0.0 }
  0x38   :  { %v80_v17 = vadd.f32 %v79_v15, %v78_v13 }
  0x3a   :  { %v82_v19 = vadd.f32 %v81_v16, %v80_v17 }
  0x3c   :  { %v84_v20 = vadd.f32 %v83_v18, %v82_v19 }
  0x3e   :  { %85 = vadd.xlane.f32.xlu0 %v84_v20 }
  0x3f   :  { %174 = shalt.err (!%p171_p12)
}
  0x40   :  { %s175_s16 = scalar_lea.hbm %s271_s2, 128 }
  0x41   :  { %p176_p13 = scmp.ne.s32.totalorder %s271_s2, %s175_s16  ;;  %p179_p0 = scmp.lt.u32.totalorder %s175_s16, %s271_s2 }
  0x43   :  { %p181_p1 = pnand %p179_p0, %p176_p13 }
  0x45   :  { %184 = shalt.err (!%p181_p1)
}
  0x46   :  { %99 = dma.vmem_to_hbm [thread:$0]  %s97_s12, 128, %s271_s2, [#allocation4]   ;;  %v53_v22 = vld [vmem:[%s272_s3] sm:$0x3] }
  0xcb   :  { %v86_v23 = vpop.xlane.xlu0 %85 }
  0xcc   :  { %v87_v24 = vadd.f32 %v86_v23, %v53_v22 }
  0xce   :  { %89 = vst.msk [vmem:[%s272_s3] sm:$0x3] %vm48_vm0, %v87_v24 }
  0xcf   :  { %189 = dma.done.wait [#allocation4], 128  }
  0xd0   :  { %190 = vsyncadd [#allocation4], 4294967168 }
  0xd1   :  { %107 = vsyncpa [#allocation3], 1 }
  0xd2   :  { %108 = vsyncpa [#allocation6], 1 }
  0xd3   :  { %109 = vsyncpa [#allocation4], 1 }

</bundles_post_ra>
